<compile_context>
chip_gen: v6e
topology: v6e:2x2x1
jax: 0.10.0
libtpu: 0.0.40
codegen_flags: <defaults>
</compile_context>

<pallas_src>
import functools

import jax
import jax.numpy as jnp
from jax import lax
from jax.experimental import pallas as pl
from jax.experimental.pallas import tpu as pltpu

NSTATS = 6          # L1sum, L2sum, Npx, bad@1, bad@3, bad@5
STATS_PAD = 128     # lane-dense output width; stats live in lanes 0..5
BAD_THS = (1.0, 3.0, 5.0)
_VMEM_LIMIT_BYTES = 32 * 1024 * 1024   # scoped-VMEM limit, safe on v5e/v6e/v7x


def _largest_mult8_divisor_le(h, limit):
    """Largest multiple-of-8 divisor of h that is <= limit (0 if none)."""
    d = (min(limit, h) // 8) * 8
    while d >= 8:
        if h % d == 0:
            return d
        d -= 8
    return 0


def _pick_tile_h(B, H, W):
    """Pick the row-tile height.

    Auto-pipelined input footprint = 2 arrays x 2 buffers x 2 chans x TH x W
    x 4 B = 32 * TH * W bytes.  We target ~2 MiB per input block (~8 MiB
    double-buffered total): already ~85% of HBM roofline, and — with the
    slab-wise kernel keeping only a few (slab, W) temporaries live — far
    inside the scoped-VMEM limit on every TPU generation (v5e 16 MiB default,
    v6e/v7x 32 MiB, v7x 64 MiB physical).
    """
    target_block_bytes = 2 * 1024 * 1024          # per-input block = 8*TH*W B
    max_th = (target_block_bytes // (8 * W)) // 8 * 8
    max_th = max(8, min(max_th, 1024))

    if H <= max_th:
        if B >= 2 or H < 16:
            return H                              # whole image per grid step
        # B == 1: split into >= 2 row tiles so both v7x TensorCores get work.
        half = _largest_mult8_divisor_le(H, (H + 1) // 2)
        return half if half else H

    # Prefer a multiple-of-8 divisor of H so the ragged-row mask compiles out.
    th = _largest_mult8_divisor_le(H, max_th)
    if th:
        return th
    return max(8, (max_th // 8) * 8)              # ragged last tile (masked)


def _pick_slab(TH):
    """Row-slab height used for in-kernel accumulation."""
    for s in (64, 32, 16, 8):
        if TH >= s and TH % s == 0:
            return s
    return TH                                     # tiny / odd tile: one slab


def _flow_metrics_kernel(pred_ref, gt_ref, out_ref, *, full_h, slab):
    # pred_ref / gt_ref block: (1, 2, TH, W); out_ref block: (1, 1, 8, 128).
    _, _, TH, W = pred_ref.shape
    t = pl.program_id(1)
    n_slabs = TH // slab
    ragged = (full_h % TH) != 0
    inf = jnp.float32(jnp.inf)

    def slab_stats(row0, row_base):
        gt0 = gt_ref[0, 0, pl.ds(row0, slab), :]
        gt1 = gt_ref[0, 1, pl.ds(row0, slab), :]
        p0 = pred_ref[0, 0, pl.ds(row0, slab), :]
        p1 = pred_ref[0, 1, pl.ds(row0, slab), :]

        # Validity mask from gt channel 0 only (== torch.isfinite):
        # abs(x) < inf is False for NaN and +/-inf, True for finite values.
        mask = jnp.abs(gt0) < inf
        if ragged:
            # Cheap (slab, 1) row-validity mask, broadcast along lanes.  Only
            # compiled in when TH does not divide H.
            rows = lax.broadcasted_iota(jnp.int32, (slab, 1), 0) + row_base
            mask = jnp.logical_and(mask, rows < full_h)
        maskf = mask.astype(jnp.float32)

        # Masked differences: invalid pixels contribute exactly 0 everywhere.
        d0 = jnp.where(mask, gt0 - p0, 0.0)
        d1 = jnp.where(mask, gt1 - p1, 0.0)
        l1 = jnp.abs(d0) + jnp.abs(d1)
        sq = d0 * d0 + d1 * d1
        l2 = jnp.sqrt(sq)             # EUP; masked pixels -> sqrt(0) == 0
        # bad@th on the squared distance (th > 0): identical to l2 > th, but
        # the compares do not wait on the EUP sqrt.
        bad = tuple(jnp.where(sq > (th * th), 1.0, 0.0) for th in BAD_THS)
        return (l1, l2, maskf) + bad

    if n_slabs <= 1:
        accs = slab_stats(0, t * TH)
    else:
        def body(s, accs):
            row0 = pl.multiple_of(s * slab, slab)
            vals = slab_stats(row0, t * TH + row0)
            return tuple(a + v for a, v in zip(accs, vals))

        init = tuple(jnp.zeros((slab, W), jnp.float32) for _ in range(NSTATS))
        accs = lax.fori_loop(0, n_slabs, body, init)

    vals = [jnp.sum(a) for a in accs]             # six small XLU reductions

    # Pack the 6 scalars into lanes 0..5 of a full (8, 128) slab so the store
    # is an unmasked, (8, 128)-aligned, lane-dense write.
    idx = lax.broadcasted_iota(jnp.int32, (8, STATS_PAD), 1)
    row = jnp.zeros((8, STATS_PAD), jnp.float32)
    for i, v in enumerate(vals):
        row = jnp.where(idx == i, v, row)
    out_ref[0, 0, :, :] = row


def flow_metrics(predictions, gt, *, tile_h=None):
    """predictions, gt: (B, 2, H, W) float32. Returns dict of scalar metrics."""
    B, C, H, W = predictions.shape
    assert C == 2 and gt.shape == predictions.shape

    TH = int(tile_h) if tile_h is not None else _pick_tile_h(B, H, W)
    TH = min(TH, H)
    if TH != H:
        assert TH % 8 == 0, "row-tile height must be a multiple of 8"
    n_tiles = -(-H // TH)
    slab = _pick_slab(TH)

    kernel = functools.partial(_flow_metrics_kernel, full_h=H, slab=slab)

    partials = pl.pallas_call(
        kernel,
        out_shape=jax.ShapeDtypeStruct((B, n_tiles, 8, STATS_PAD), jnp.float32),
        grid_spec=pltpu.PrefetchScalarGridSpec(
            num_scalar_prefetch=0,
            grid=(B, n_tiles),
            in_specs=[
                pl.BlockSpec((1, 2, TH, W), lambda b, t: (b, 0, t, 0)),
                pl.BlockSpec((1, 2, TH, W), lambda b, t: (b, 0, t, 0)),
            ],
            out_specs=pl.BlockSpec((1, 1, 8, STATS_PAD),
                                   lambda b, t: (b, t, 0, 0)),
        ),
        compiler_params=pltpu.CompilerParams(
            dimension_semantics=("parallel", "parallel"),
            vmem_limit_bytes=_VMEM_LIMIT_BYTES,
        ),
    )(predictions, gt)

    # Tiny glue: sum partial stats over row-tiles, then per-image normalize
    # and batch-mean (matches the PyTorch module exactly).
    # NOTE: if an image has zero valid pixels, npx == 0 and the metrics become
    # NaN/Inf — same behavior as the PyTorch module.
    stats = jnp.sum(partials[:, :, 0, :NSTATS], axis=1)       # (B, NSTATS)
    l1sum, l2sum, npx = stats[:, 0], stats[:, 1], stats[:, 2]

    metrics = {
        "L1err": jnp.mean(l1sum / npx),
        "EPE": jnp.mean(l2sum / npx),
    }
    for i, th in enumerate(BAD_THS):
        metrics["bad@{:.1f}".format(th)] = jnp.mean(stats[:, 3 + i] / npx) * 100.0
    return metrics


def _flow_metrics_ref(predictions, gt):
    """Pure-JAX reference mirroring the PyTorch module exactly."""
    B = predictions.shape[0]
    mask = jnp.isfinite(gt[:, 0, :, :])
    npx = mask.reshape(B, -1).sum(axis=1)
    gtc = jnp.where(mask[:, None, :, :], gt, 999999.0)
    l1 = (jnp.abs(gtc - predictions).sum(axis=1) * mask).reshape(B, -1)
    l2 = (jnp.sqrt(jnp.sum(jnp.square(gtc - predictions), axis=1)) * mask).reshape(B, -1)
    out = {
        "L1err": jnp.mean(l1.sum(axis=1) / npx),
        "EPE": jnp.mean(l2.sum(axis=1) / npx),
    }
    for th in BAD_THS:
        out["bad@{:.1f}".format(th)] = jnp.mean(
            ((l2 > th) * mask.reshape(B, -1)).sum(axis=1) / npx
        ) * 100.0
    return out


if __name__ == "__main__":
    key = jax.random.PRNGKey(0)

    def make_inputs(k, B, H, W):
        kp, kg = jax.random.split(k)
        pred = jax.random.normal(kp, (B, 2, H, W), jnp.float32) * 2.0
        gt = jax.random.normal(kg, (B, 2, H, W), jnp.float32) * 3.0
        # Inject some invalid (non-finite) ground-truth pixels in channel 0.
        gt = gt.at[0, 0, 0:3, 0:5].set(jnp.inf)
        if B > 1:
            gt = gt.at[1, 0, 4:6, 7:9].set(jnp.nan)
        return pred, gt

    cases = [
        dict(B=2, H=16, W=16, tile_h=None),    # whole-image tile, B >= 2
        dict(B=2, H=16, W=16, tile_h=8),       # two even row-tiles
        dict(B=2, H=24, W=16, tile_h=16),      # ragged last tile (row masking)
        dict(B=2, H=12, W=16, tile_h=None),    # whole-image tile, H % 8 != 0
        dict(B=1, H=32, W=16, tile_h=None),    # B == 1 -> auto-split (v7x path)
        dict(B=1, H=128, W=128, tile_h=128),   # multi-slab fori_loop path
    ]
    for i, case in enumerate(cases):
        k = jax.random.fold_in(key, i)
        pred, gt = make_inputs(k, case["B"], case["H"], case["W"])
        got = flow_metrics(pred, gt, tile_h=case["tile_h"])
        got = {kk: jax.block_until_ready(v) for kk, v in got.items()}
        ref = _flow_metrics_ref(pred, gt)
        for kk in ref:
            assert jnp.allclose(got[kk], ref[kk], rtol=1e-4, atol=1e-4), (
                case, kk, got[kk], ref[kk])

    print("KERNEL_OK")
</pallas_src>

<mosaic_0001>
module attributes {stable_mosaic.version = 11 : i64} {
  func.func @_flow_metrics_kernel(%arg0: i32, %arg1: i32, %arg2: memref<1x2x16x16xf32, #tpu.memory_space<vmem>>, %arg3: memref<1x2x16x16xf32, #tpu.memory_space<vmem>>, %arg4: memref<1x1x8x128xf32, #tpu.memory_space<vmem>>) attributes {dimension_semantics = [#tpu.dimension_semantics<parallel>, #tpu.dimension_semantics<parallel>], iteration_bounds = array<i64: 2, 1>, scalar_prefetch = 0 : i64, scratch_operands = 0 : i64, tpu.core_type = #tpu.core_type<tc>, window_params = [{transform_indices = @transform_0, window_bounds = array<i64: 1, 2, 16, 16>}, {transform_indices = @transform_1, window_bounds = array<i64: 1, 2, 16, 16>}, {transform_indices = @transform_2, window_bounds = array<i64: 1, 1, 8, 128>}]} {
    %c0 = arith.constant 0 : index
    %c0_0 = arith.constant 0 : index
    %c0_1 = arith.constant 0 : index
    %c0_2 = arith.constant 0 : index
    %0 = vector.load %arg3[%c0, %c0_0, %c0_1, %c0_2] : memref<1x2x16x16xf32, #tpu.memory_space<vmem>>, vector<1x1x16x16xf32>
    %1 = vector.shape_cast %0 : vector<1x1x16x16xf32> to vector<16x16xf32>
    %c0_3 = arith.constant 0 : index
    %c1 = arith.constant 1 : index
    %c0_4 = arith.constant 0 : index
    %c0_5 = arith.constant 0 : index
    %2 = vector.load %arg3[%c0_3, %c1, %c0_4, %c0_5] : memref<1x2x16x16xf32, #tpu.memory_space<vmem>>, vector<1x1x16x16xf32>
    %3 = vector.shape_cast %2 : vector<1x1x16x16xf32> to vector<16x16xf32>
    %c0_6 = arith.constant 0 : index
    %c0_7 = arith.constant 0 : index
    %c0_8 = arith.constant 0 : index
    %c0_9 = arith.constant 0 : index
    %4 = vector.load %arg2[%c0_6, %c0_7, %c0_8, %c0_9] : memref<1x2x16x16xf32, #tpu.memory_space<vmem>>, vector<1x1x16x16xf32>
    %5 = vector.shape_cast %4 : vector<1x1x16x16xf32> to vector<16x16xf32>
    %c0_10 = arith.constant 0 : index
    %c1_11 = arith.constant 1 : index
    %c0_12 = arith.constant 0 : index
    %c0_13 = arith.constant 0 : index
    %6 = vector.load %arg2[%c0_10, %c1_11, %c0_12, %c0_13] : memref<1x2x16x16xf32, #tpu.memory_space<vmem>>, vector<1x1x16x16xf32>
    %7 = vector.shape_cast %6 : vector<1x1x16x16xf32> to vector<16x16xf32>
    %8 = math.absf %1 : vector<16x16xf32>
    %cst = arith.constant 0x7F800000 : f32
    %9 = vector.broadcast %cst : f32 to vector<16x16xf32>
    %10 = arith.cmpf olt, %8, %9 : vector<16x16xf32>
    %11 = arith.extui %10 : vector<16x16xi1> to vector<16x16xi32>
    %12 = arith.sitofp %11 : vector<16x16xi32> to vector<16x16xf32>
    %13 = arith.subf %1, %5 : vector<16x16xf32>
    %cst_14 = arith.constant 0.000000e+00 : f32
    %14 = vector.broadcast %cst_14 : f32 to vector<16x16xf32>
    %15 = arith.select %10, %13, %14 : vector<16x16xi1>, vector<16x16xf32>
    %16 = arith.subf %3, %7 : vector<16x16xf32>
    %cst_15 = arith.constant 0.000000e+00 : f32
    %17 = vector.broadcast %cst_15 : f32 to vector<16x16xf32>
    %18 = arith.select %10, %16, %17 : vector<16x16xi1>, vector<16x16xf32>
    %19 = math.absf %15 : vector<16x16xf32>
    %20 = math.absf %18 : vector<16x16xf32>
    %21 = arith.addf %19, %20 : vector<16x16xf32>
    %22 = arith.mulf %15, %15 : vector<16x16xf32>
    %23 = arith.mulf %18, %18 : vector<16x16xf32>
    %24 = arith.addf %22, %23 : vector<16x16xf32>
    %25 = math.sqrt %24 : vector<16x16xf32>
    %cst_16 = arith.constant 1.000000e+00 : f32
    %26 = vector.broadcast %cst_16 : f32 to vector<16x16xf32>
    %27 = arith.cmpf ogt, %24, %26 : vector<16x16xf32>
    %cst_17 = arith.constant 1.000000e+00 : f32
    %cst_18 = arith.constant 0.000000e+00 : f32
    %28 = vector.broadcast %cst_17 : f32 to vector<16x16xf32>
    %29 = vector.broadcast %cst_18 : f32 to vector<16x16xf32>
    %30 = arith.select %27, %28, %29 : vector<16x16xi1>, vector<16x16xf32>
    %cst_19 = arith.constant 9.000000e+00 : f32
    %31 = vector.broadcast %cst_19 : f32 to vector<16x16xf32>
    %32 = arith.cmpf ogt, %24, %31 : vector<16x16xf32>
    %cst_20 = arith.constant 1.000000e+00 : f32
    %cst_21 = arith.constant 0.000000e+00 : f32
    %33 = vector.broadcast %cst_20 : f32 to vector<16x16xf32>
    %34 = vector.broadcast %cst_21 : f32 to vector<16x16xf32>
    %35 = arith.select %32, %33, %34 : vector<16x16xi1>, vector<16x16xf32>
    %cst_22 = arith.constant 2.500000e+01 : f32
    %36 = vector.broadcast %cst_22 : f32 to vector<16x16xf32>
    %37 = arith.cmpf ogt, %24, %36 : vector<16x16xf32>
    %cst_23 = arith.constant 1.000000e+00 : f32
    %cst_24 = arith.constant 0.000000e+00 : f32
    %38 = vector.broadcast %cst_23 : f32 to vector<16x16xf32>
    %39 = vector.broadcast %cst_24 : f32 to vector<16x16xf32>
    %40 = arith.select %37, %38, %39 : vector<16x16xi1>, vector<16x16xf32>
    %41 = vector.shape_cast %21 : vector<16x16xf32> to vector<1x16x16xf32>
    %cst_25 = arith.constant dense<0.000000e+00> : vector<1xf32>
    %42 = vector.multi_reduction <add>, %41, %cst_25 [1, 2] : vector<1x16x16xf32> to vector<1xf32>
    %43 = vector.shape_cast %42 : vector<1xf32> to vector<1x1x1xf32>
    %44 = vector.extract %43[0, 0, 0] : f32 from vector<1x1x1xf32>
    %45 = vector.shape_cast %25 : vector<16x16xf32> to vector<1x16x16xf32>
    %cst_26 = arith.constant dense<0.000000e+00> : vector<1xf32>
    %46 = vector.multi_reduction <add>, %45, %cst_26 [1, 2] : vector<1x16x16xf32> to vector<1xf32>
    %47 = vector.shape_cast %46 : vector<1xf32> to vector<1x1x1xf32>
    %48 = vector.extract %47[0, 0, 0] : f32 from vector<1x1x1xf32>
    %49 = vector.shape_cast %12 : vector<16x16xf32> to vector<1x16x16xf32>
    %cst_27 = arith.constant dense<0.000000e+00> : vector<1xf32>
    %50 = vector.multi_reduction <add>, %49, %cst_27 [1, 2] : vector<1x16x16xf32> to vector<1xf32>
    %51 = vector.shape_cast %50 : vector<1xf32> to vector<1x1x1xf32>
    %52 = vector.extract %51[0, 0, 0] : f32 from vector<1x1x1xf32>
    %53 = vector.shape_cast %30 : vector<16x16xf32> to vector<1x16x16xf32>
    %cst_28 = arith.constant dense<0.000000e+00> : vector<1xf32>
    %54 = vector.multi_reduction <add>, %53, %cst_28 [1, 2] : vector<1x16x16xf32> to vector<1xf32>
    %55 = vector.shape_cast %54 : vector<1xf32> to vector<1x1x1xf32>
    %56 = vector.extract %55[0, 0, 0] : f32 from vector<1x1x1xf32>
    %57 = vector.shape_cast %35 : vector<16x16xf32> to vector<1x16x16xf32>
    %cst_29 = arith.constant dense<0.000000e+00> : vector<1xf32>
    %58 = vector.multi_reduction <add>, %57, %cst_29 [1, 2] : vector<1x16x16xf32> to vector<1xf32>
    %59 = vector.shape_cast %58 : vector<1xf32> to vector<1x1x1xf32>
    %60 = vector.extract %59[0, 0, 0] : f32 from vector<1x1x1xf32>
    %61 = vector.shape_cast %40 : vector<16x16xf32> to vector<1x16x16xf32>
    %cst_30 = arith.constant dense<0.000000e+00> : vector<1xf32>
    %62 = vector.multi_reduction <add>, %61, %cst_30 [1, 2] : vector<1x16x16xf32> to vector<1xf32>
    %63 = vector.shape_cast %62 : vector<1xf32> to vector<1x1x1xf32>
    %64 = vector.extract %63[0, 0, 0] : f32 from vector<1x1x1xf32>
    %65 = tpu.iota {dimensions = array<i32: 1>} : vector<8x128xi32>
    %cst_31 = arith.constant 0.000000e+00 : f32
    %66 = vector.broadcast %cst_31 : f32 to vector<8x128xf32>
    %c0_i32 = arith.constant 0 : i32
    %67 = vector.broadcast %c0_i32 : i32 to vector<8x128xi32>
    %68 = arith.cmpi eq, %65, %67 : vector<8x128xi32>
    %69 = vector.broadcast %44 : f32 to vector<8x128xf32>
    %70 = arith.select %68, %69, %66 : vector<8x128xi1>, vector<8x128xf32>
    %c1_i32 = arith.constant 1 : i32
    %71 = vector.broadcast %c1_i32 : i32 to vector<8x128xi32>
    %72 = arith.cmpi eq, %65, %71 : vector<8x128xi32>
    %73 = vector.broadcast %48 : f32 to vector<8x128xf32>
    %74 = arith.select %72, %73, %70 : vector<8x128xi1>, vector<8x128xf32>
    %c2_i32 = arith.constant 2 : i32
    %75 = vector.broadcast %c2_i32 : i32 to vector<8x128xi32>
    %76 = arith.cmpi eq, %65, %75 : vector<8x128xi32>
    %77 = vector.broadcast %52 : f32 to vector<8x128xf32>
    %78 = arith.select %76, %77, %74 : vector<8x128xi1>, vector<8x128xf32>
    %c3_i32 = arith.constant 3 : i32
    %79 = vector.broadcast %c3_i32 : i32 to vector<8x128xi32>
    %80 = arith.cmpi eq, %65, %79 : vector<8x128xi32>
    %81 = vector.broadcast %56 : f32 to vector<8x128xf32>
    %82 = arith.select %80, %81, %78 : vector<8x128xi1>, vector<8x128xf32>
    %c4_i32 = arith.constant 4 : i32
    %83 = vector.broadcast %c4_i32 : i32 to vector<8x128xi32>
    %84 = arith.cmpi eq, %65, %83 : vector<8x128xi32>
    %85 = vector.broadcast %60 : f32 to vector<8x128xf32>
    %86 = arith.select %84, %85, %82 : vector<8x128xi1>, vector<8x128xf32>
    %c5_i32 = arith.constant 5 : i32
    %87 = vector.broadcast %c5_i32 : i32 to vector<8x128xi32>
    %88 = arith.cmpi eq, %65, %87 : vector<8x128xi32>
    %89 = vector.broadcast %64 : f32 to vector<8x128xf32>
    %90 = arith.select %88, %89, %86 : vector<8x128xi1>, vector<8x128xf32>
    %c0_32 = arith.constant 0 : index
    %c0_33 = arith.constant 0 : index
    %c0_34 = arith.constant 0 : index
    %c0_35 = arith.constant 0 : index
    %91 = vector.load %arg4[%c0_32, %c0_33, %c0_34, %c0_35] : memref<1x1x8x128xf32, #tpu.memory_space<vmem>>, vector<1x1x8x128xf32>
    %92 = vector.shape_cast %91 : vector<1x1x8x128xf32> to vector<8x128xf32>
    %93 = vector.shape_cast %90 : vector<8x128xf32> to vector<1x1x8x128xf32>
    tpu.vector_store %arg4[%c0_32, %c0_33, %c0_34, %c0_35], %93 {strides = array<i32>} : memref<1x1x8x128xf32, #tpu.memory_space<vmem>>, vector<1x1x8x128xf32>,
    return
  }
  func.func @transform_0(%arg0: i32, %arg1: i32) -> (i32, i32, i32, i32) {
    %c0_i32 = arith.constant 0 : i32
    %c0_i32_0 = arith.constant 0 : i32
    %c0_i32_1 = arith.constant 0 : i32
    return %arg0, %c0_i32, %arg1, %c0_i32_0 : i32, i32, i32, i32
  }
  func.func @transform_1(%arg0: i32, %arg1: i32) -> (i32, i32, i32, i32) {
    %c0_i32 = arith.constant 0 : i32
    %c0_i32_0 = arith.constant 0 : i32
    %c0_i32_1 = arith.constant 0 : i32
    return %arg0, %c0_i32, %arg1, %c0_i32_0 : i32, i32, i32, i32
  }
  func.func @transform_2(%arg0: i32, %arg1: i32) -> (i32, i32, i32, i32) {
    %c0_i32 = arith.constant 0 : i32
    %c0_i32_0 = arith.constant 0 : i32
    %c0_i32_1 = arith.constant 0 : i32
    return %arg0, %arg1, %c0_i32, %c0_i32_0 : i32, i32, i32, i32
  }
}

</mosaic_0001>

<bundles_post_ra>
// kernel: tpu_custom_call.1
= control target key start
LH: loop header
LB: loop body
LE: loop exit
PB: predicated region body
PF: predicated region fallthrough
CT: control target
= control target key end

     0   :  { %7 = vsyncpa [#allocation3], 0  ;;  %s978_s0 = inlined_call_operand.hbm [shape: f32[2,2,16,16], index: 0, kind: input, shape index: {}]   ;;  %s979_s1 = inlined_call_operand.hbm [shape: f32[2,2,16,16], index: 1, kind: input, shape index: {}]   ;;  %s980_s2 = inlined_call_operand.hbm [shape: f32[2,1,8,128], index: 2, kind: output, shape index: {}]  }
   0x1   :  { %9 = vsyncpa [#allocation3 + $0x1], 0 }
   0x2   :  { %10 = vsyncpa [#allocation6], 0 }
   0x3   :  { %12 = vsyncpa [#allocation6 + $0x1], 0 }
   0x4   :  { %13 = vsyncpa [#allocation4], 0 }
   0x5   :  { %15 = vsyncpa [#allocation4 + $0x1], 0  ;;  %s782_s9 = smov 0   ;;  %s784_s10 = smov 0  }
   0x6   :  { %s786_s11 = smov 0   ;;  %s788_s12 = smov 0  }
   0x7   :  { %s790_s13 = smov 0   ;;  %s792_s14 = smov 0  }
   0x8 LB: > { %s507_s15 = sadd.s32 4294967295, %s759_s14   ;;  %s508_s16 = sadd.s32 4294967294, %s759_s14   ;;  %s759_s14 = sphi %s792_s14, %s21_s14   ;;  %s755_s13 = sphi %s790_s13, %s993_s13   ;;  %s751_s12 = sphi %s788_s12, %s992_s12   ;;  %s747_s11 = sphi %s786_s11, %s991_s11   ;;  %s743_s10 = sphi %s784_s10, %s990_s10   ;;  %s739_s9 = sphi %s782_s9, %s989_s9  }
   0x9   : > { %s33_s17 = sadd.s32 1, %s755_s13  ;;  %s42_s18 = sadd.s32 1, %s747_s11 }
   0xa   : > { %p35_p0 = scmp.ge.s32.totalorder %s33_s17, 2  ;;  %p49_p1 = scmp.ne.s32.totalorder %s747_s11, %s743_s10 }
   0xb   : > { %p50_p2 = scmp.eq.s32.totalorder %s759_s14, 0  ;;  %p55_p3 = scmp.ne.s32.totalorder %s743_s10, %s739_s9 }
   0xc   : > { %s995_s17 = smov (%p35_p0, %s33_s17), 0  ;;  %p56_p5 = scmp.eq.s32.totalorder %s507_s15, 0 }
   0xd   : > { %p823_p4 = por %p50_p2, %p49_p1  ;;  %s37_s20 = ssub.s32 %s755_s13, %s995_s17 }
   0xe   : > { %p109_p6 = scmp.eq.s32.totalorder %s507_s15, 1  ;;  %p40_p7 = scmp.eq.s32.totalorder %s37_s20, 0 }
   0xf   : > { %p829_p8 = por %p56_p5, %p55_p3  ;;  %p115_p10 = scmp.eq.s32.totalorder %s508_s16, 1 }
  0x10   : > { %p833_p9 = por %p109_p6, %p49_p1  ;;  %p510_p12 = scmp.ge.s32.totalorder %s759_s14, 2 }
  0x11   : > { %s838_s23 = scalar_select %p40_p7, %s747_s11, %s42_s18  }
  0x12   : > { %p840_p11 = por %p115_p10, %p55_p3  ;;  %p562_p13 = scmp.lt.s32.totalorder %s759_s14, 2 }
  0x13   : > { %s847_s25 = sand.u32 1, %s747_s11   ;;  %s531_s27 = sshll.u32 %s755_s13, 9 }
  0x14   : > { %s511_s26 = sshll.u32 %s847_s25, 5  ;;  %s147_s30 = scalar_lea.hbm %s978_s0, %s531_s27 }
  0x15   : > { %s139_s3 = scalar_lea.vmem [#allocation2], %s511_s26  ;;  %p860_p0 = pnand %p562_p13, %p823_p4 }
  0x16   : > { %s148_s4 = sshll.u32 %s139_s3, 4  ;;  %p517_p1 = scmp.ge.s32.totalorder %s759_s14, 1  ;;  %s149_s4 = int_to_ptr.vmem [resolvable:$true] %s148_s4 }
  0x17   : > { %s136_s6 = scalar_lea.sflag [#allocation3], %s847_s25  ;;  %p621_p2 = pneg %p860_p0 }
  0x18   : > { %s632_s7 = scalar_lea.vmem %s149_s4, 512  ;;  %s761_s8 = smov [#allocation2]  }
  0x19   : > { %p633_p3 = scmp.ne.s32.totalorder %s149_s4, %s632_s7  ;;  %s637_s15 = sshll.u32 %s761_s8, 4  ;;  %s638_s15 = int_to_ptr.vmem [resolvable:$false] %s637_s15 }
  0x1a   : > { %s639_s16 = scalar_lea.vmem %s638_s15, 1024  ;;  %p640_p4 = scmp.lt.s32.totalorder %s149_s4, %s638_s15 }
  0x1b   : > { %p635_p5 = pnand %p633_p3, %p621_p2  ;;  %p641_p7 = scmp.lt.s32.totalorder %s639_s16, %s632_s7 }
  0x1d   : > { %p636_p6 = pneg %p635_p5  ;;  %p642_p10 = por %p641_p7, %p640_p4 }
  0x1f   : > { %p643_p13 = pnand %p642_p10, %p636_p6 }
  0x21   : > { %646 = shalt.err (!%p643_p13)
}
  0x22   : > { %s762_s18 = smov 128   ;;  %s763_s19 = smov 8  }
  0x23   : > { %554 = dma.hbm_to_vmem [thread:$0]  (!%p860_p0), %s147_s30, 512, %s149_s4, %s136_s6, %s762_s18, %s762_s18, %s763_s19  }
  0x24   : > { %p179_p3 = scmp.lt.s32.totalorder %s759_s14, 3  ;;  %s170_s29 = scalar_lea.hbm %s979_s1, %s531_s27 }
  0x25   : > { %s162_s7 = scalar_lea.vmem [#allocation5], %s511_s26  ;;  %s159_s15 = scalar_lea.sflag [#allocation6], %s847_s25 }
  0x26   : > { %p881_p5 = pnand %p517_p1, %p179_p3  ;;  %s171_s8 = sshll.u32 %s162_s7, 4  ;;  %s172_s8 = int_to_ptr.vmem [resolvable:$true] %s171_s8 }
  0x27   : > { %s660_s16 = scalar_lea.vmem %s172_s8, 512  ;;  %s764_s30 = smov [#allocation5]  }
  0x28   : > { %p661_p6 = scmp.ne.s32.totalorder %s172_s8, %s660_s16  ;;  %s665_s4 = sshll.u32 %s764_s30, 4  ;;  %s666_s4 = int_to_ptr.vmem [resolvable:$false] %s665_s4 }
  0x29   : > { %s667_s27 = scalar_lea.vmem %s666_s4, 1024  ;;  %p668_p10 = scmp.lt.s32.totalorder %s172_s8, %s666_s4 }
  0x2a   : > { %p663_p4 = pnand %p661_p6, %p621_p2  ;;  %p669_p1 = scmp.lt.s32.totalorder %s667_s27, %s660_s16 }
  0x2c   : > { %p664_p7 = pneg %p663_p4  ;;  %p670_p13 = por %p669_p1, %p668_p10 }
  0x2e   : > { %p671_p3 = pnand %p670_p13, %p664_p7 }
  0x30   : > { %674 = shalt.err (!%p671_p3)
}
  0x31   : > { %557 = dma.hbm_to_vmem [thread:$0]  (!%p860_p0), %s170_s29, 512, %s172_s8, %s159_s15, %s762_s18, %s762_s18, %s763_s19  }
  0x32   : > { %183 = sbr.rel (%p881_p5) target bundleno = 314 (0x13a), region = 28  ;;  %s896_s25 = sand.u32 (!%p881_p5), 1, %s743_s10  }
  0x33   : > { %s518_s26 = sshll.u32 (!%p881_p5), %s896_s25, 5  ;;  %s186_s6 = scalar_lea.sflag (!%p881_p5), [#allocation3], %s896_s25 }
  0x34   : > { %s189_s20 = scalar_lea.vmem (!%p881_p5), [#allocation2], %s518_s26 }
  0x37   : > { %726 = dma.done.wait (%p829_p8), %s186_s6, 512  }
  0x38   : > { %728 = vsyncadd (%p829_p8), %s186_s6, 4294966784  ;;  %s195_s5 = scalar_lea.sflag [#allocation6], %s896_s25  ;;  %s198_s18 = scalar_lea.vmem [#allocation5], %s518_s26 }
  0x39   : > { %730 = dma.done.wait (%p829_p8), %s195_s5, 512  }
  0x3a   : > { %732 = vsyncadd (%p829_p8), %s195_s5, 4294966784  ;;  %v226_v0 = vld [vmem:[%s198_s18] sm:$0xff]  ;;  %v227_v1 = vld [vmem:[%s198_s18 + $0x8] sm:$0xff]  ;;  %vm290_vm2 = vcmask 130048   ;;  %v765_v16 = vmov 0.0   ;;  %s520_s19 = sshll.u32 %s896_s25, 3 }
  0x3b   : > { %v521_v2 = vld [vmem:[%s198_s18 + $0x10] sm:$0xff]  ;;  %v522_v3 = vld [vmem:[%s198_s18 + $0x18] sm:$0xff]  ;;  %v231_v4 = vld [vmem:[%s189_s20] sm:$0xff]  ;;  %v236_v6 = vand.u32 2147483647, %v226_v0  ;;  %s528_s7 = sshll.u32 %s751_s12, 7 }
  0x3c   : > { %v232_v5 = vld [vmem:[%s189_s20 + $0x8] sm:$0xff]  ;;  %v523_v7 = vld [vmem:[%s189_s20 + $0x10] sm:$0xff]  ;;  %v524_v8 = vld [vmem:[%s189_s20 + $0x18] sm:$0xff]  ;;  %v237_v9 = vand.u32 2147483647, %v227_v1  ;;  %v244_v10 = vsub.f32 %v226_v0, %v231_v4  ;;  %s223_s8 = scalar_lea.vmem [#allocation7], %s520_s19  ;;  %s936_s26 = scalar_lea.hbm %s980_s2, %s528_s7 }
  0x3d   : > { %v245_v11 = vsub.f32 %v227_v1, %v232_v5  ;;  %vm238_vm0 = vcmp.lt.f32.partialorder %v236_v6, inf  ;;  %v248_v12 = vsub.f32 %v521_v2, %v523_v7  ;;  %v249_v13 = vsub.f32 %v522_v3, %v524_v8  ;;  %s399_s15 = sshll.u32 %s223_s8, 4  ;;  %s385_s6 = scalar_lea.sflag [#allocation4], %s896_s25  ;;  %s400_s15 = int_to_ptr.vmem [resolvable:$true] %s399_s15 }
  0x3e   : > { %vm909_vm1 = vcmp.lt.f32.partialorder %v237_v9, inf  ;;  %v246_v15 = vsel %vm238_vm0, %v244_v10, 0.0  ;;  %v525_v17 = vsel %vm238_vm0, 1.0, %v765_v16  ;;  %s675_s12 = scalar_lea.vmem %s400_s15, 128  ;;  %s766_s20 = smov [#allocation7]  }
  0x3f   : > { %v247_v18 = vsel %vm909_vm1, %v245_v11, 0.0  ;;  %v250_v19 = vsel %vm238_vm0, %v248_v12, 0.0  ;;  %v251_v20 = vsel %vm909_vm1, %v249_v13, 0.0  ;;  %v252_v21 = vand.u32 2147483647, %v246_v15  ;;  %p676_p8 = scmp.ne.s32.totalorder %s400_s15, %s675_s12  ;;  %s679_s5 = sshll.u32 %s766_s20, 4  ;;  %s680_s5 = int_to_ptr.vmem [resolvable:$false] %s679_s5 }
  0x40   : > { %v253_v22 = vand.u32 2147483647, %v247_v18  ;;  %v254_v23 = vand.u32 2147483647, %v250_v19  ;;  %v255_v24 = vand.u32 2147483647, %v251_v20  ;;  %v258_v25 = vmul.f32 %v246_v15, %v246_v15  ;;  %p682_p5 = scmp.lt.s32.totalorder %s400_s15, %s680_s5 }
  0x41   : > { %v259_v26 = vmul.f32 %v247_v18, %v247_v18  ;;  %v260_v27 = vmul.f32 %v250_v19, %v250_v19  ;;  %v261_v28 = vmul.f32 %v251_v20, %v251_v20  ;;  %v526_v29 = vsel %vm909_vm1, 1.0, %v765_v16  ;;  %p677_p0 = pnand %p676_p8, %p833_p9  ;;  %s681_s18 = scalar_lea.vmem %s680_s5, 256 }
  0x42   : > { %v256_v30 = vadd.f32 %v254_v23, %v252_v21  ;;  %v257_v31 = vadd.f32 %v255_v24, %v253_v22  ;;  %v315_v32 = vsel %vm290_vm2, %v525_v17, 0.0  ;;  %v316_v33 = vsel %vm290_vm2, %v526_v29, 0.0  ;;  %p683_p6 = scmp.lt.s32.totalorder %s681_s18, %s675_s12 }
  0x43   : > { %v262_v34 = vadd.f32 %v260_v27, %v258_v25  ;;  %v263_v35 = vadd.f32 %v261_v28, %v259_v26  ;;  %v317_v36 = vadd.f32 %v316_v33, %v315_v32  ;;  %p678_p2 = pneg %p677_p0 }
  0x44   : > { %v291_v37 = vsel %vm290_vm2, %v256_v30, 0.0  ;;  %v292_v38 = vsel %vm290_vm2, %v257_v31, 0.0  ;;  %p684_p4 = por %p683_p6, %p682_p5 }
  0x45   : > { %v293_v39 = vadd.f32 %v292_v38, %v291_v37  ;;  %318 = vadd.xlane.f32.xlu1 %v317_v36  ;;  %vm278_vm3 = vcmp.gt.f32.partialorder %v262_v34, 1.0  ;;  %vm279_vm4 = vcmp.gt.f32.partialorder %v263_v35, 1.0  ;;  %vm286_vm5 = vcmp.gt.f32.partialorder %v262_v34, 25.0 }
  0x46   : > { %v280_v40 = vsel %vm278_vm3, 1.0, %v765_v16  ;;  %v281_v41 = vsel %vm279_vm4, 1.0, %v765_v16  ;;  %vm287_vm6 = vcmp.gt.f32.partialorder %v263_v35, 25.0  ;;  %v288_v42 = vsel %vm286_vm5, 1.0, %v765_v16  ;;  %p685_p7 = pnand %p684_p4, %p678_p2 }
  0x47   : > { %294 = vadd.xlane.f32.xlu0 %v293_v39  ;;  %v327_v43 = vsel %vm290_vm2, %v280_v40, 0.0  ;;  %v328_v44 = vsel %vm290_vm2, %v281_v41, 0.0  ;;  %v289_v45 = vsel %vm287_vm6, 1.0, %v765_v16  ;;  %v351_v46 = vsel %vm290_vm2, %v288_v42, 0.0 }
  0x48   : > { %v329_v47 = vadd.f32 %v328_v44, %v327_v43  ;;  %v352_v48 = vsel %vm290_vm2, %v289_v45, 0.0  ;;  %615 = vrsqrt.f32 %v262_v34  ;;  %vm266_vm7 = vcmp.eq.f32.partialorder %v262_v34, inf }
  0x49   : > { %617 = vrsqrt.f32 %v263_v35  ;;  %v353_v49 = vadd.f32 %v352_v48, %v351_v46  ;;  %v269_v51 = vand.u32 2147483648, %v262_v34  ;;  %vm282_vm8 = vcmp.gt.f32.partialorder %v262_v34, 9.0 }
  0x4a   : > { %330 = vadd.xlane.f32.xlu1 %v329_v47  ;;  %vm283_vm9 = vcmp.gt.f32.partialorder %v263_v35, 9.0  ;;  %vm268_vm10 = vcmp.eq.f32.partialorder %v262_v34, 0.0  ;;  %vm273_vm11 = vcmp.eq.f32.partialorder %v263_v35, inf  ;;  %v276_v54 = vand.u32 2147483648, %v263_v35 }
  0x4b   : > { %vm275_vm12 = vcmp.eq.f32.partialorder %v263_v35, 0.0  ;;  %v284_v57 = vsel %vm282_vm8, 1.0, %v765_v16  ;;  %v285_v58 = vsel %vm283_vm9, 1.0, %v765_v16  ;;  %v363_v46 = vlaneseq }
  0x4c   : > { %v339_v0 = vsel %vm290_vm2, %v284_v57, 0.0  ;;  %v340_v1 = vsel %vm290_vm2, %v285_v58, 0.0 }
  0x4d   : > { %v341_v3 = vadd.f32 %v340_v1, %v339_v0  ;;  %v364_v47 = vand.u32 127, %v363_v46 }
  0x4e   : > { %354 = vadd.xlane.f32.xlu1 %v353_v49 }
  0x4f   : > { %vm365_vm13 = vcmp.eq.s32.totalorder %v364_v47, 0  ;;  %vm368_vm14 = vcmp.eq.s32.totalorder %v364_v47, 1  ;;  %vm371_vm15 = vcmp.eq.s32.totalorder %v364_v47, 2  ;;  %vm374_vm0 = vcmp.eq.s32.totalorder %v364_v47, 3 }
  0x50   : > { %vm377_vm1 = vcmp.eq.s32.totalorder %v364_v47, 4 }
  0x55   : > { %v616_v50 = vpop.eup %615 }
  0x56   : > { %v618_v52 = vpop.eup %617  ;;  %v265_v53 = vmul.f32 %v616_v50, %v262_v34 }
  0x57   : > { %v272_v55 = vmul.f32 %v618_v52, %v263_v35 }
  0x58   : > { %v267_v56 = vsel %vm266_vm7, %v262_v34, %v265_v53 }
  0x59   : > { %v270_v59 = vsel %vm268_vm10, %v269_v51, %v267_v56  ;;  %v274_v60 = vsel %vm273_vm11, %v263_v35, %v272_v55 }
  0x5a   : > { %v277_v61 = vsel %vm275_vm12, %v276_v54, %v274_v60  ;;  %v303_v62 = vsel %vm290_vm2, %v270_v59, 0.0 }
  0x5b   : > { %v304_v63 = vsel %vm290_vm2, %v277_v61, 0.0  ;;  %vm380_vm2 = vcmp.eq.s32.totalorder %v364_v47, 5 }
  0x5c   : > { %v305_v2 = vadd.f32 %v304_v63, %v303_v62 }
  0x5e   : > { %306 = vadd.xlane.f32.xlu0 %v305_v2 }
  0x62   : > { %342 = vadd.xlane.f32.xlu0 %v341_v3 }
  0xce   : > { %v319_v7 = vpop.xlane.xlu1 %318 }
  0xcf   : > { %v320_v13 = vrot.slane %v319_v7, 4 }
  0xd0   : > { %v295_v4 = vpop.xlane.xlu0 %294 }
  0xd1   : > { %v296_v5 = vrot.slane %v295_v4, 4  ;;  %v321_v16 = vadd.f32 %v320_v13, %v319_v7 }
  0xd3   : > { %v297_v6 = vadd.f32 %v296_v5, %v295_v4  ;;  %v331_v11 = vpop.xlane.xlu1 %330  ;;  %v322_v19 = vrot.slane %v321_v16, 2 }
  0xd4   : > { %v332_v14 = vrot.slane %v331_v11, 4 }
  0xd5   : > { %v298_v8 = vrot.slane %v297_v6, 2  ;;  %v323_v27 = vadd.f32 %v322_v19, %v321_v16 }
  0xd6   : > { %v333_v18 = vadd.f32 %v332_v14, %v331_v11 }
  0xd7   : > { %v299_v9 = vadd.f32 %v298_v8, %v297_v6  ;;  %v355_v15 = vpop.xlane.xlu1 %354  ;;  %v324_v34 = vrot.slane %v323_v27, 1 }
  0xd8   : > { %v356_v17 = vrot.slane %v355_v15, 4  ;;  %v334_v22 = vrot.slane %v333_v18, 2 }
  0xd9   : > { %v300_v10 = vrot.slane %v299_v9, 1  ;;  %v325_v40 = vadd.f32 %v324_v34, %v323_v27 }
  0xda   : > { %v357_v20 = vadd.f32 %v356_v17, %v355_v15  ;;  %v335_v30 = vadd.f32 %v334_v22, %v333_v18 }
  0xdb   : > { %v301_v12 = vadd.f32 %v300_v10, %v299_v9 }
  0xdc   : > { %v358_v25 = vrot.slane %v357_v20, 2  ;;  %v336_v37 = vrot.slane %v335_v30, 1 }
  0xdd   : > { %533 = vpush %v301_v12 }
  0xde   : > { %v359_v33 = vadd.f32 %v358_v25, %v357_v20  ;;  %v337_v42 = vadd.f32 %v336_v37, %v335_v30 }
  0xe0   : > { %v360_v41 = vrot.slane %v359_v33, 1 }
  0xe2   : > { %v361_v45 = vadd.f32 %v360_v41, %v359_v33 }
  0xe7   : > { %v307_v21 = vpop.xlane.xlu0 %306 }
  0xe8   : > { %v308_v23 = vrot.slane %v307_v21, 4 }
  0xea   : > { %v309_v24 = vadd.f32 %v308_v23, %v307_v21 }
  0xeb   : > { %v343_v26 = vpop.xlane.xlu0 %342 }
  0xec   : > { %v310_v28 = vrot.slane %v309_v24, 2  ;;  %v344_v29 = vrot.slane %v343_v26, 4 }
  0xee   : > { %v345_v31 = vadd.f32 %v344_v29, %v343_v26  ;;  %v311_v32 = vadd.f32 %v310_v28, %v309_v24 }
  0xf0   : > { %v346_v35 = vrot.slane %v345_v31, 2  ;;  %v312_v36 = vrot.slane %v311_v32, 1 }
  0xf2   : > { %v347_v38 = vadd.f32 %v346_v35, %v345_v31  ;;  %v313_v39 = vadd.f32 %v312_v36, %v311_v32 }
  0xf4   : > { %535 = vpush %v313_v39  ;;  %v348_v43 = vrot.slane %v347_v38, 1 }
  0xf5   : > { %537 = vpush %v325_v40 }
  0xf6   : > { %539 = vpush %v337_v42  ;;  %v349_v44 = vadd.f32 %v348_v43, %v347_v38 }
  0xf8   : > { %541 = vpush %v349_v44 }
  0xf9   : > { %543 = vpush %v361_v45 }
 0x10e   : > { %s534_s21 = spop %533 }
 0x10f   : > { %v366_v48 = vstv %s534_s21 }
 0x110   : > { %v367_v49 = vsel %vm365_vm13, %v366_v48, 0.0 }
 0x125   : > { %s536_s28 = spop %535 }
 0x126   : > { %v369_v50 = vstv %s536_s28  ;;  %s538_s29 = spop %537 }
 0x127   : > { %v370_v51 = vsel %vm368_vm14, %v369_v50, %v367_v49  ;;  %v372_v52 = vstv %s538_s29  ;;  %s540_s3 = spop %539 }
 0x128   : > { %v373_v53 = vsel %vm371_vm15, %v372_v52, %v370_v51  ;;  %v375_v54 = vstv %s540_s3 }
 0x129   : > { %v376_v55 = vsel %vm374_vm0, %v375_v54, %v373_v53  ;;  %s542_s16 = spop %541 }
 0x12a   : > { %v378_v56 = vstv %s542_s16  ;;  %s544_s30 = spop %543 }
 0x12b   : > { %v379_v57 = vsel %vm377_vm1, %v378_v56, %v376_v55  ;;  %v381_v58 = vstv %s544_s30 }
 0x12c   : > { %v382_v59 = vsel %vm380_vm2, %v381_v58, %v379_v57 }
 0x12d   : > { %383 = vst [vmem:[%s223_s8] sm:$0xff] %v382_v59 }
 0x12e   : > { %688 = shalt.err (!%p685_p7)
}
 0x12f   : > { %s689_s21 = scalar_lea.hbm %s936_s26, 128  ;;  %s693_s28 = scalar_lea.hbm %s980_s2, 256 }
 0x130   : > { %p690_p10 = scmp.ne.s32.totalorder %s936_s26, %s689_s21  ;;  %p694_p3 = scmp.lt.s32.totalorder %s936_s26, %s980_s2 }
 0x131   : > { %p695_p8 = scmp.lt.s32.totalorder %s693_s28, %s689_s21 }
 0x132   : > { %p691_p1 = pnand %p690_p10, %p833_p9 }
 0x133   : > { %p696_p0 = por %p695_p8, %p694_p3 }
 0x134   : > { %p692_p13 = pneg %p691_p1 }
 0x136   : > { %p697_p2 = pnand %p696_p0, %p692_p13 }
 0x138   : > { %700 = shalt.err (!%p697_p2)
}
 0x139   : > { %549 = dma.vmem_to_hbm [thread:$0]  (%p833_p9), %s400_s15, 128, %s936_s26, %s385_s6  }
 0x13a PF: > { %s411_s7 = sand.u32 1, %s739_s9   ;;  %p559_p5 = pnand %p510_p12, %p840_p11 }
 0x13b   : > { %s412_s8 = scalar_lea.sflag [#allocation4], %s411_s7 }
 0x13c   : > { %p560_p6 = pneg %p559_p5 }
 0x13e   : > { %734 = dma.done.wait (%p560_p6), %s412_s8, 128  }
 0x13f   : > { %736 = vsyncadd (%p560_p6), %s412_s8, 4294967168  ;;  %s21_s14 = sadd.s32 1, %s759_s14   ;;  %s989_s9 = smov %s743_s10 }
 0x140   : > { %p18_p4 = scmp.ge.s32.totalorder %s21_s14, 4   ;;  %s990_s10 = smov %s747_s11 }
 0x141   : > { %s991_s11 = smov %s838_s23  ;;  %s992_s12 = smov %s755_s13 }
 0x142   : > { %s993_s13 = smov %s995_s17  ;;  %20 = sbr.rel (!%p18_p4) target bundleno = 8 (0x8), region = 88 }
 0x147   :  { %417 = vsyncpa [#allocation3], 1 }
 0x148   :  { %419 = vsyncpa [#allocation3 + $0x1], 1 }
 0x149   :  { %420 = vsyncpa [#allocation6], 1 }
 0x14a   :  { %422 = vsyncpa [#allocation6 + $0x1], 1 }
 0x14b   :  { %423 = vsyncpa [#allocation4], 1 }
 0x14c   :  { %425 = vsyncpa [#allocation4 + $0x1], 1 }

</bundles_post_ra>
